<compile_context>
chip_gen: v7x
topology: tpu7x:2x2x1
jax: 0.10.0
libtpu: 0.0.40
codegen_flags: <defaults>
</compile_context>

<pallas_src>
import functools

import jax
import jax.numpy as jnp
from jax.experimental import pallas as pl
from jax.experimental.pallas import tpu as pltpu


def _loss_transform(x, margin):
    """full_loss of the reference, computed in f32."""
    if margin is not None:
        s = jnp.float32(margin) - x
        ms = jnp.maximum(s, 0.0)
        return ms * ms - 0.05 * jnp.maximum(-s, 0.0)
    return -x


def _dense_kernel(x_ref, y_ref, out_ref, *, margin, cd):
    """One grid step = one block of B samples (all C class rows streamed).

    x_ref:   (B, C*C*D)  lane-dense sample block (any float dtype, upcast here)
    y_ref:   (B, 1)      int32 labels; -1 marks padded samples (contribute 0)
    out_ref: (1, 1)      f32 partial loss for this block
    """
    x = x_ref[...].astype(jnp.float32)          # (B, CCD)
    yv = y_ref[...]                             # (B, 1)
    loss = _loss_transform(x, margin)           # dense on all class rows

    # Own-class row selection via a lane-range mask: lanes [y*cd, (y+1)*cd) are
    # X[i, y[i], :, :] in the row-major flattening. Generated in-kernel (free
    # VALU filler in an HBM-bound regime); no extra input stream needed.
    ccd = x.shape[1]
    lane = jax.lax.broadcasted_iota(jnp.int32, (1, ccd), 1)   # (1, CCD)
    lo = yv * cd                                              # (B, 1); y=-1 never matches
    mask = (lane >= lo) & (lane < lo + cd)                    # (B, CCD)

    # Keep the select (NOT loss * mask) so NaN/Inf from class rows the reference
    # never reads cannot leak into the sum.  Single whole-block reduction keeps
    # the XLU off the critical path (one final cross-lane reduce instead of B).
    out_ref[...] = jnp.sum(jnp.where(mask, loss, 0.0), keepdims=True)   # (1, 1)


def _gather_kernel(y_sref, x_ref, out_ref, *, margin):
    """One grid step = one sample; x_ref is already the gathered X[i, y[i]].

    y_sref:  (N,)   int32 labels in SMEM (consumed by the index_map, not here)
    x_ref:   (C, D) selected class-row slab for sample i
    out_ref: (1, 1) f32 per-sample loss
    """
    del y_sref
    x = x_ref[...].astype(jnp.float32)
    out_ref[...] = jnp.sum(_loss_transform(x, margin), keepdims=True)


def pairwise_loss(X, y, nclasses, margin=None, block_samples=None,
                  gather_threshold_bytes=4096):
    """X: (N, C, C, D) float (f32 or bf16), y: (N,) int.  Returns scalar f32 loss."""
    N, C1, C2, D = X.shape
    assert C1 == nclasses and C2 == nclasses
    cd = C2 * D
    ccd = C1 * cd
    itemsize = jnp.dtype(X.dtype).itemsize
    yi = y.astype(jnp.int32)

    # ---------------- gather path: fetch only X[i, y[i]] --------------------
    if cd * itemsize >= gather_threshold_bytes:
        kernel = functools.partial(_gather_kernel, margin=margin)
        partials = pl.pallas_call(
            kernel,
            out_shape=jax.ShapeDtypeStruct((N, 1, 1), jnp.float32),
            grid_spec=pltpu.PrefetchScalarGridSpec(
                num_scalar_prefetch=1,          # y -> SMEM, visible to index_maps
                grid=(N,),
                in_specs=[pl.BlockSpec(
                    (pl.Squeezed(), pl.Squeezed(), C2, D),
                    lambda i, y_ref: (i, y_ref[i], 0, 0))],   # data-dependent fetch
                out_specs=pl.BlockSpec(
                    (pl.Squeezed(), 1, 1), lambda i, y_ref: (i, 0, 0)),
            ),
            compiler_params=pltpu.CompilerParams(
                dimension_semantics=("parallel",)),
        )(yi, X)
        # TODO(synk): for mid-sized rows (~4 KiB .. ~0.5 MiB) a B-sample block with
        # an in-kernel make_async_copy row-gather (memory_space=pl.ANY, y in SMEM,
        # 4-8 in-flight DMAs) would amortize the ~0.35 us per-grid-step overhead.
        return jnp.sum(partials)

    # ---------------- dense path: tiny rows, stream + mask ------------------
    if block_samples is None:
        lane_padded = pl.cdiv(ccd, 128) * 128
        per_sample_bytes = lane_padded * itemsize
        # ~6 MiB per X block (double-buffered => ~12 MiB): amortizes per-step
        # overhead; vmem_limit_bytes below keeps it legal on v5e/v6e/v7x.
        B = (6 * 1024 * 1024) // per_sample_bytes
        B = min(B, 4096)
        # v7x megacore: keep G >= 2 so both TensorCores get work when N allows.
        B = min(B, max(8, (pl.cdiv(N, 2) // 8) * 8))
        # Sublane-friendly block height (16 keeps bf16 packing clean as well).
        B = max(8, (B // 16) * 16 if B >= 16 else 8)
    else:
        B = max(1, min(int(block_samples), N))
    G = pl.cdiv(N, B)
    Np = G * B

    Xf = X.reshape(N, ccd)                       # lane-dense, free reshape
    if Np != N:                                  # pad batch to a multiple of B
        Xf = jnp.pad(Xf, ((0, Np - N), (0, 0)))
        yi = jnp.pad(yi, (0, Np - N), constant_values=-1)   # -1 => masked out
    Xb = Xf.reshape(G, B, ccd)
    yb = yi.reshape(G, B, 1)

    kernel = functools.partial(_dense_kernel, margin=margin, cd=cd)
    partials = pl.pallas_call(
        kernel,
        out_shape=jax.ShapeDtypeStruct((G, 1, 1), jnp.float32),
        grid=(G,),
        in_specs=[
            pl.BlockSpec((pl.Squeezed(), B, ccd), lambda g: (g, 0, 0)),
            pl.BlockSpec((pl.Squeezed(), B, 1), lambda g: (g, 0, 0)),
        ],
        out_specs=pl.BlockSpec((pl.Squeezed(), 1, 1), lambda g: (g, 0, 0)),
        compiler_params=pltpu.CompilerParams(
            dimension_semantics=("parallel",),
            vmem_limit_bytes=32 * 1024 * 1024,
        ),
    )(Xb, yb)

    # TODO(synk): rebalance=True path is stateful (updates self.rebalance); not implemented.
    # TODO(synk): pairwise_weights argument not supported (module default is None).
    return jnp.sum(partials)


def pairwise_loss_ref(X, y, nclasses, margin=None):
    """Pure-JAX reference matching the PyTorch forward."""
    N = X.shape[0]
    scores = X[jnp.arange(N), y]                       # (N, C, D)
    if margin is not None:
        s = margin - scores
        ms = jnp.maximum(s, 0.0)
        scores = -1.0 * (ms * ms - 0.05 * jnp.maximum(-s, 0.0))
    return jnp.sum(-1.0 * scores)


if __name__ == "__main__":
    key = jax.random.PRNGKey(0)
    kx, ky = jax.random.split(key)

    N, C, D = 8, 4, 16                                 # batch, nclasses, trailing dim
    X = jax.random.normal(kx, (N, C, C, D), dtype=jnp.float32)
    y = jax.random.randint(ky, (N,), 0, C, dtype=jnp.int32)

    ref0 = pairwise_loss_ref(X, y, nclasses=C, margin=None)
    ref1 = pairwise_loss_ref(X, y, nclasses=C, margin=1.0)

    # dense path (default for these tiny rows), no-margin and margin variants
    out0 = pairwise_loss(X, y, nclasses=C, margin=None)
    out1 = pairwise_loss(X, y, nclasses=C, margin=1.0)
    # forced small block -> exercises batch padding + multi-block partial sums
    out2 = pairwise_loss(X, y, nclasses=C, margin=1.0, block_samples=3)
    # forced gather path -> exercises scalar-prefetch data-dependent index_map
    out3 = pairwise_loss(X, y, nclasses=C, margin=1.0, gather_threshold_bytes=0)
    out4 = pairwise_loss(X, y, nclasses=C, margin=None, gather_threshold_bytes=0)
    # bf16 storage (halves HBM bytes), f32 compute in-kernel
    Xb16 = X.astype(jnp.bfloat16)
    ref_b16 = pairwise_loss_ref(Xb16.astype(jnp.float32), y, nclasses=C, margin=1.0)
    out5 = pairwise_loss(Xb16, y, nclasses=C, margin=1.0)

    jax.block_until_ready((out0, out1, out2, out3, out4, out5))
    assert jnp.allclose(out0, ref0, rtol=1e-5, atol=1e-5), (out0, ref0)
    assert jnp.allclose(out1, ref1, rtol=1e-5, atol=1e-5), (out1, ref1)
    assert jnp.allclose(out2, ref1, rtol=1e-5, atol=1e-5), (out2, ref1)
    assert jnp.allclose(out3, ref1, rtol=1e-5, atol=1e-5), (out3, ref1)
    assert jnp.allclose(out4, ref0, rtol=1e-5, atol=1e-5), (out4, ref0)
    assert jnp.allclose(out5, ref_b16, rtol=1e-4, atol=1e-4), (out5, ref_b16)
    print("KERNEL_OK")
</pallas_src>

<mosaic_0001>
module attributes {stable_mosaic.version = 11 : i64} {
  func.func @_dense_kernel(%arg0: i32, %arg1: memref<1x8x256xf32, #tpu.memory_space<vmem>>, %arg2: memref<1x8x1xi32, #tpu.memory_space<vmem>>, %arg3: memref<1x1x1xf32, #tpu.memory_space<vmem>>) attributes {dimension_semantics = [#tpu.dimension_semantics<parallel>], iteration_bounds = array<i64: 1>, scalar_prefetch = 0 : i64, scratch_operands = 0 : i64, tpu.core_type = #tpu.core_type<tc>, window_params = [{transform_indices = @transform_0, window_bounds = array<i64: 1, 8, 256>}, {transform_indices = @transform_1, window_bounds = array<i64: 1, 8, 1>}, {transform_indices = @transform_2, window_bounds = array<i64: 1, 1, 1>}]} {
    %c0 = arith.constant 0 : index
    %c0_0 = arith.constant 0 : index
    %c0_1 = arith.constant 0 : index
    %0 = vector.load %arg1[%c0, %c0_0, %c0_1] : memref<1x8x256xf32, #tpu.memory_space<vmem>>, vector<1x8x256xf32>
    %1 = vector.shape_cast %0 : vector<1x8x256xf32> to vector<8x256xf32>
    %c0_2 = arith.constant 0 : index
    %c0_3 = arith.constant 0 : index
    %c0_4 = arith.constant 0 : index
    %2 = vector.load %arg2[%c0_2, %c0_3, %c0_4] : memref<1x8x1xi32, #tpu.memory_space<vmem>>, vector<1x8x1xi32>
    %3 = vector.shape_cast %2 : vector<1x8x1xi32> to vector<8x1xi32>
    %cst = arith.constant 0.000000e+00 : f32
    %4 = vector.broadcast %cst : f32 to vector<8x256xf32>
    %5 = arith.subf %4, %1 : vector<8x256xf32>
    %6 = tpu.iota {dimensions = array<i32: 1>} : vector<1x256xi32>
    %c64_i32 = arith.constant 64 : i32
    %7 = vector.broadcast %c64_i32 : i32 to vector<8x1xi32>
    %8 = arith.muli %3, %7 : vector<8x1xi32>
    %9 = vector.broadcast %6 : vector<1x256xi32> to vector<8x256xi32>
    %10 = vector.broadcast %8 : vector<8x1xi32> to vector<8x256xi32>
    %11 = arith.cmpi sge, %9, %10 : vector<8x256xi32>
    %c64_i32_5 = arith.constant 64 : i32
    %12 = vector.broadcast %c64_i32_5 : i32 to vector<8x1xi32>
    %13 = arith.addi %8, %12 : vector<8x1xi32>
    %14 = vector.broadcast %6 : vector<1x256xi32> to vector<8x256xi32>
    %15 = vector.broadcast %13 : vector<8x1xi32> to vector<8x256xi32>
    %16 = arith.cmpi slt, %14, %15 : vector<8x256xi32>
    %17 = arith.andi %11, %16 : vector<8x256xi1>
    %cst_6 = arith.constant 0.000000e+00 : f32
    %18 = vector.broadcast %cst_6 : f32 to vector<8x256xf32>
    %19 = arith.select %17, %5, %18 : vector<8x256xi1>, vector<8x256xf32>
    %20 = vector.shape_cast %19 : vector<8x256xf32> to vector<1x8x256xf32>
    %cst_7 = arith.constant dense<0.000000e+00> : vector<1xf32>
    %21 = vector.multi_reduction <add>, %20, %cst_7 [1, 2] : vector<1x8x256xf32> to vector<1xf32>
    %22 = vector.shape_cast %21 : vector<1xf32> to vector<1x1x1xf32>
    %23 = vector.extract %22[0, 0, 0] : f32 from vector<1x1x1xf32>
    %24 = vector.broadcast %23 : f32 to vector<1x1xf32>
    %c0_8 = arith.constant 0 : index
    %c0_9 = arith.constant 0 : index
    %c0_10 = arith.constant 0 : index
    %25 = vector.load %arg3[%c0_8, %c0_9, %c0_10] : memref<1x1x1xf32, #tpu.memory_space<vmem>>, vector<1x1x1xf32>
    %26 = vector.shape_cast %25 : vector<1x1x1xf32> to vector<1x1xf32>
    %27 = vector.shape_cast %24 : vector<1x1xf32> to vector<1x1x1xf32>
    tpu.vector_store %arg3[%c0_8, %c0_9, %c0_10], %27 {strides = array<i32>} : memref<1x1x1xf32, #tpu.memory_space<vmem>>, vector<1x1x1xf32>,
    return
  }
  func.func @transform_0(%arg0: i32) -> (i32, i32, i32) {
    %c0_i32 = arith.constant 0 : i32
    %c0_i32_0 = arith.constant 0 : i32
    %c0_i32_1 = arith.constant 0 : i32
    return %arg0, %c0_i32, %c0_i32_0 : i32, i32, i32
  }
  func.func @transform_1(%arg0: i32) -> (i32, i32, i32) {
    %c0_i32 = arith.constant 0 : i32
    %c0_i32_0 = arith.constant 0 : i32
    %c0_i32_1 = arith.constant 0 : i32
    return %arg0, %c0_i32, %c0_i32_0 : i32, i32, i32
  }
  func.func @transform_2(%arg0: i32) -> (i32, i32, i32) {
    %c0_i32 = arith.constant 0 : i32
    %c0_i32_0 = arith.constant 0 : i32
    %c0_i32_1 = arith.constant 0 : i32
    return %arg0, %c0_i32, %c0_i32_0 : i32, i32, i32
  }
}

</mosaic_0001>

<bundles_post_ra>
// kernel: tpu_custom_call.1
= control target key start
LH: loop header
LB: loop body
LE: loop exit
PB: predicated region body
PF: predicated region fallthrough
CT: control target
= control target key end

     0   :  { %7 = vsyncpa [#allocation3], 0  ;;  %s175_s0 = inlined_call_operand.hbm [shape: f32[1,8,256], index: 0, kind: input, shape index: {}]   ;;  %s176_s1 = inlined_call_operand.vmem [shape: s32[1,8,1], index: 1, kind: input, shape index: {}]   ;;  %s177_s2 = inlined_call_operand.hbm [shape: f32[1,1,1], index: 2, kind: output, shape index: {}]  }
   0x1   :  { %8 = vsyncpa [#allocation4], 0  ;;  %s130_s9 = smov [#allocation2]   ;;  %s82_s13 = scalar_lea.hbm %s175_s0, 256 }
   0x2   :  { %s15_s10 = sshll.u32 %s130_s9, 4  ;;  %p83_p0 = scmp.ne.s32.totalorder %s175_s0, %s82_s13  ;;  %s16_s10 = int_to_ptr.vmem [resolvable:$true] %s15_s10 }
   0x3   :  { %p86_p1 = scmp.lt.u32.totalorder %s82_s13, %s175_s0 }
   0x5   :  { %p88_p2 = pnand %p86_p1, %p83_p0 }
   0x7   :  { %91 = shalt.err (!%p88_p2)
}
   0x8   :  { %s92_s18 = scalar_lea.vmem %s16_s10, 256  ;;  %p97_p4 = scmp.lt.s32.totalorder %s16_s10, %s16_s10 }
   0x9   :  { %p93_p3 = scmp.ne.s32.totalorder %s16_s10, %s92_s18  ;;  %p98_p5 = scmp.lt.s32.totalorder %s92_s18, %s92_s18 }
   0xb   :  { %p99_p6 = por %p98_p5, %p97_p4 }
   0xd   :  { %p100_p7 = pnand %p99_p6, %p93_p3 }
   0xf   :  { %103 = shalt.err (!%p100_p7)
}
  0x10   :  { %18 = dma.hbm_to_vmem [thread:$0]  %s175_s0, 256, %s16_s10, [#allocation3]  }
  0x11   :  { %126 = dma.done.wait [#allocation3], 256  }
  0x12   :  { %127 = vsyncadd [#allocation3], 4294967040  ;;  %v131_v0 = vmov 0   ;;  %v26_v1 = vld [vmem:[%s176_s1] sm:$0xff]  ;;  %v29_v4 = vlaneseq  ;;  %v25_v8 = vld [vmem:[#allocation2 + $0x8] sm:$0xff]  ;;  %s132_s0 = smov [#allocation5]  }
  0x13   :  { %81 = vset.pattern.permute.xlu0 %v131_v0  ;;  %v32_v2 = vmul.u32 64, %v26_v1  ;;  %v24_v7 = vld [vmem:[#allocation2] sm:$0xff]  ;;  %v28_v12 = vsub.f32 0.0, %v25_v8  ;;  %s67_s1 = sshll.u32 %s132_s0, 4  ;;  %vm59_vm6 = vcmask 0   ;;  %s68_s1 = int_to_ptr.vmem [resolvable:$true] %s67_s1 }
  0x14   :  { %v30_v5 = vand.u32 127, %v29_v4  ;;  %v27_v10 = vsub.f32 0.0, %v24_v7  ;;  %s104_s24 = scalar_lea.vmem %s68_s1, 16  ;;  %s108_s25 = scalar_lea.vmem %s68_s1, 32 }
  0x15   :  { %34 = vperm.xlu0 %81, %v32_v2   ;;  %v38_v3 = vadd.s32 64, %v32_v2  ;;  %p105_p8 = scmp.ne.s32.totalorder %s68_s1, %s104_s24  ;;  %p109_p9 = scmp.lt.s32.totalorder %s68_s1, %s68_s1 }
  0x16   :  { %v31_v9 = vadd.s32 128, %v30_v5  ;;  %p110_p10 = scmp.lt.s32.totalorder %s108_s25, %s104_s24 }
  0x18   :  { %p111_p11 = por %p110_p10, %p109_p9 }
  0x19   :  { %40 = vperm.xlu0 %81, %v38_v3  }
  0x1a   :  { %p112_p12 = pnand %p111_p11, %p105_p8 }
  0x94   :  { %v35_v6 = vpop.permute.xlu0 %34 }
  0x95   :  { %vm36_vm0 = vcmp.ge.s32.totalorder %v30_v5, %v35_v6  ;;  %vm37_vm3 = vcmp.ge.s32.totalorder %v31_v9, %v35_v6 }
  0x98   :  { %v41_v11 = vpop.permute.xlu0 %40 }
  0x99   :  { %vm42_vm1 = vcmp.lt.s32.totalorder %v30_v5, %v41_v11  ;;  %vm43_vm2 = vcmp.lt.s32.totalorder %v31_v9, %v41_v11 }
  0x9a   :  { %vm44_vm4 = vmand %vm36_vm0, %vm42_vm1 }
  0x9b   :  { %vm45_vm5 = vmand %vm37_vm3, %vm43_vm2  ;;  %v46_v13 = vsel %vm44_vm4, %v27_v10, 0.0 }
  0x9c   :  { %v47_v14 = vsel %vm45_vm5, %v28_v12, 0.0 }
  0x9d   :  { %v48_v15 = vadd.f32 %v47_v14, %v46_v13 }
  0x9f   :  { %49 = vadd.xlane.f32.xlu1 %v48_v15 }
 0x12c   :  { %v50_v16 = vpop.xlane.xlu1 %49 }
 0x12d   :  { %v51_v17 = vrot.slane %v50_v16, 4 }
 0x12f   :  { %v52_v18 = vadd.f32 %v51_v17, %v50_v16 }
 0x131   :  { %v53_v19 = vrot.slane %v52_v18, 2 }
 0x133   :  { %v54_v20 = vadd.f32 %v53_v19, %v52_v18 }
 0x135   :  { %v55_v21 = vrot.slane %v54_v20, 1 }
 0x137   :  { %v56_v22 = vadd.f32 %v55_v21, %v54_v20 }
 0x139   :  { %76 = vpush %v56_v22 }
 0x16a   :  { %s77_s23 = spop %76 }
 0x16b   :  { %v58_v23 = vstv %s77_s23 }
 0x16c   :  { %60 = vst.msk [vmem:[#allocation5] sm:$0x1] %vm59_vm6, %v58_v23 }
 0x16d   :  { %115 = shalt.err (!%p112_p12)
}
 0x16e   :  { %s116_s28 = scalar_lea.hbm %s177_s2, 16 }
 0x16f   :  { %p117_p13 = scmp.ne.s32.totalorder %s177_s2, %s116_s28  ;;  %p120_p0 = scmp.lt.u32.totalorder %s116_s28, %s177_s2 }
 0x171   :  { %p122_p1 = pnand %p120_p0, %p117_p13 }
 0x173   :  { %125 = shalt.err (!%p122_p1)
}
 0x174   :  { %70 = dma.vmem_to_hbm [thread:$0]  %s68_s1, 16, %s177_s2, [#allocation4]  }
 0x175   :  { %128 = dma.done.wait [#allocation4], 16  }
 0x176   :  { %129 = vsyncadd [#allocation4], 4294967280 }
 0x177   :  { %74 = vsyncpa [#allocation3], 1 }
 0x178   :  { %75 = vsyncpa [#allocation4], 1 }

</bundles_post_ra>
